<compile_context>
chip_gen: v5e
topology: v5e:2x2
jax: 0.10.0
libtpu: 0.0.40
codegen_flags: <defaults>
</compile_context>

<pallas_src>
import functools

import jax
import jax.numpy as jnp
from jax.experimental import pallas as pl
from jax.experimental.pallas import tpu as pltpu

EPS = 1e-5  # PyTorch BatchNorm2d default eps


# --------------------------------------------------------------------------
# Tile-size heuristics
# --------------------------------------------------------------------------
def _pick_row_tile(H, W):
    """Rows of output per conv grid step: aim for ~128-512 matmul M rows and
    >=2 tiles per image when possible (pipelining / megacore work)."""
    best = H
    for th in range(H, 0, -1):
        if H % th == 0 and th * W <= 512:
            best = th
            break
    if best == H and H % 2 == 0 and (H // 2) * W >= 128:
        best = H // 2
    return best


def _pick_norm_tile(nrows):
    """Row tile for the normalize pass: largest divisor <=1024 that keeps the
    second-minor block dim 8-aligned (or the full extent)."""
    for tr in range(min(nrows, 1024), 0, -1):
        if nrows % tr == 0 and (tr % 8 == 0 or tr == nrows):
            return tr
    return nrows


# --------------------------------------------------------------------------
# Kernel 1: conv (fused-K single matmul per row tile) + fused BN statistics
# --------------------------------------------------------------------------
def conv_kernel(xp_ref, w_ref, o_ref, ssum_ref, ssq_ref, *,
                kh, kw, dilation, th, total):
    # xp_ref : (1, Hp, Wp, Cin)  padded image for this batch element
    # w_ref  : (KH*KW*Cin, Cout) folded weights
    # o_ref  : (1, th, W, Cout)  output row tile
    # ssum_ref, ssq_ref : (1, 1, 1, Cout) per-tile sum / sum-of-squares
    t = pl.program_id(1)
    W = o_ref.shape[2]
    cout = o_ref.shape[3]
    cin = xp_ref.shape[3]

    # Halo slab of padded input rows needed for this row tile (loaded once).
    slab = xp_ref[0, pl.ds(t * th, th + total), :, :]      # (th+total, Wp, Cin)

    # im2col-lite: shifted copies concatenated along channels -> one matmul
    # with K = kh*kw*Cin (keeps the MXU busy instead of kh*kw tiny matmuls).
    cols = []
    for dy in range(kh):
        for dx in range(kw):
            oy = dy * dilation
            ox = dx * dilation
            tap = slab[oy:oy + th, ox:ox + W, :]            # (th, W, Cin)
            cols.append(tap.reshape(th * W, cin))
    patch = jnp.concatenate(cols, axis=1)                   # (th*W, kh*kw*Cin)

    acc = jnp.dot(patch, w_ref[...],
                  preferred_element_type=jnp.float32)       # (th*W, Cout)

    # NOTE: conv bias is intentionally NOT added: it cancels exactly in
    # training-mode BatchNorm (mean subtraction).
    o_ref[0] = acc.reshape(th, W, cout).astype(o_ref.dtype)

    # Fused BN statistics for this tile (avoids re-reading the activations).
    ssum_ref[0, 0] = jnp.sum(acc, axis=0, keepdims=True)
    ssq_ref[0, 0] = jnp.sum(acc * acc, axis=0, keepdims=True)


# --------------------------------------------------------------------------
# Kernel 2: normalize (precomputed per-channel scale/shift) + activation.
# Operates on activations viewed as (N*H, W*Cout) -> lane-dense last dim.
# --------------------------------------------------------------------------
def bn_act_kernel(y_ref, scale_ref, shift_ref, o_ref, *, activation):
    y = y_ref[...] * scale_ref[...] + shift_ref[...]
    if activation == "relu":
        y = jnp.maximum(y, 0.0)
    elif activation == "leaky_relu":
        y = jnp.where(y >= 0.0, y, 0.01 * y)     # PyTorch default slope
    elif activation is not None:
        raise ValueError("Bad activation")
    o_ref[...] = y.astype(o_ref.dtype)


# --------------------------------------------------------------------------
# Wrapper
# --------------------------------------------------------------------------
def conv_block(x_nchw, w, bias, gamma, beta, *, activation="relu",
               kernel_size=3, dilation_rate=1):
    """x_nchw: (N, Cin, H, W). w: (Cout, Cin, KH, KW). Returns (N, Cout, H, W)."""
    if activation not in ("relu", "leaky_relu", None):
        raise ValueError("Bad activation")
    del bias  # cancels exactly under training-mode BatchNorm

    N, Cin, H, W = x_nchw.shape
    Cout = w.shape[0]
    kh = kw = kernel_size

    # NCHW -> NHWC; weights -> folded (KH*KW*Cin, Cout)
    x = jnp.transpose(x_nchw, (0, 2, 3, 1)).astype(jnp.float32)
    w_fold = jnp.transpose(w, (2, 3, 1, 0)).reshape(kh * kw * Cin, Cout)
    w_fold = w_fold.astype(jnp.float32)

    # 'same' padding, stride 1; effective kernel = d*(k-1)+1.
    total = dilation_rate * (kernel_size - 1)
    pad_lo, pad_hi = total // 2, total - total // 2
    xp = jnp.pad(x, ((0, 0), (pad_lo, pad_hi), (pad_lo, pad_hi), (0, 0)))
    Hp, Wp = H + total, W + total

    th = _pick_row_tile(H, W)
    T = H // th

    conv_out, ssum, ssq = pl.pallas_call(
        functools.partial(conv_kernel, kh=kh, kw=kw, dilation=dilation_rate,
                          th=th, total=total),
        out_shape=(
            jax.ShapeDtypeStruct((N, H, W, Cout), jnp.float32),
            jax.ShapeDtypeStruct((N, T, 1, Cout), jnp.float32),
            jax.ShapeDtypeStruct((N, T, 1, Cout), jnp.float32),
        ),
        grid_spec=pltpu.PrefetchScalarGridSpec(
            num_scalar_prefetch=0,
            grid=(N, T),
            in_specs=[
                pl.BlockSpec((1, Hp, Wp, Cin), lambda n, t: (n, 0, 0, 0)),
                pl.BlockSpec((kh * kw * Cin, Cout), lambda n, t: (0, 0)),
            ],
            out_specs=[
                pl.BlockSpec((1, th, W, Cout), lambda n, t: (n, t, 0, 0)),
                pl.BlockSpec((1, 1, 1, Cout), lambda n, t: (n, t, 0, 0)),
                pl.BlockSpec((1, 1, 1, Cout), lambda n, t: (n, t, 0, 0)),
            ],
        ),
        compiler_params=pltpu.CompilerParams(
            dimension_semantics=("parallel", "parallel"),
            vmem_limit_bytes=32 * 1024 * 1024),
    )(xp, w_fold)

    # Reduce the tiny per-tile stats -> per-channel scale/shift (plain JAX).
    cnt = jnp.float32(N * H * W)
    s = jnp.sum(ssum, axis=(0, 1, 2))                    # (Cout,)
    sq = jnp.sum(ssq, axis=(0, 1, 2))                    # (Cout,)
    mean = s / cnt
    var = jnp.maximum(sq / cnt - mean * mean, 0.0)       # biased (training) var
    inv = jax.lax.rsqrt(var + EPS)
    scale = gamma.astype(jnp.float32) * inv
    shift = beta.astype(jnp.float32) - mean * scale

    # Normalize + activation, lane-dense layout (N*H, W*Cout).
    NH, WC = N * H, W * Cout
    y2 = conv_out.reshape(NH, WC)
    scale_row = jnp.tile(scale, W).reshape(1, WC)
    shift_row = jnp.tile(shift, W).reshape(1, WC)
    tr = _pick_norm_tile(NH)

    out_flat = pl.pallas_call(
        functools.partial(bn_act_kernel, activation=activation),
        out_shape=jax.ShapeDtypeStruct((NH, WC), jnp.float32),
        grid_spec=pltpu.PrefetchScalarGridSpec(
            num_scalar_prefetch=0,
            grid=(NH // tr,),
            in_specs=[
                pl.BlockSpec((tr, WC), lambda i: (i, 0)),
                pl.BlockSpec((1, WC), lambda i: (0, 0)),
                pl.BlockSpec((1, WC), lambda i: (0, 0)),
            ],
            out_specs=pl.BlockSpec((tr, WC), lambda i: (i, 0)),
        ),
        compiler_params=pltpu.CompilerParams(
            dimension_semantics=("parallel",),
            vmem_limit_bytes=32 * 1024 * 1024),
    )(y2, scale_row, shift_row)

    out = out_flat.reshape(N, H, W, Cout)
    return jnp.transpose(out, (0, 3, 1, 2))               # back to NCHW


# --------------------------------------------------------------------------
# Pure-JAX reference (same semantics) for verification.
# --------------------------------------------------------------------------
def conv_block_ref(x_nchw, w, bias, gamma, beta, *, activation="relu",
                   dilation_rate=1):
    y = jax.lax.conv_general_dilated(
        x_nchw, w, window_strides=(1, 1), padding="SAME",
        rhs_dilation=(dilation_rate, dilation_rate),
        dimension_numbers=("NCHW", "OIHW", "NCHW"))
    y = y + bias.reshape(1, -1, 1, 1)
    mean = jnp.mean(y, axis=(0, 2, 3), keepdims=True)
    var = jnp.mean((y - mean) ** 2, axis=(0, 2, 3), keepdims=True)
    y = (y - mean) * jax.lax.rsqrt(var + EPS)
    y = y * gamma.reshape(1, -1, 1, 1) + beta.reshape(1, -1, 1, 1)
    if activation == "relu":
        y = jnp.maximum(y, 0.0)
    elif activation == "leaky_relu":
        y = jnp.where(y >= 0.0, y, 0.01 * y)
    return y


if __name__ == "__main__":
    key = jax.random.PRNGKey(0)
    k_x, k_w, k_b, k_g, k_be = jax.random.split(key, 5)

    N, Cin, H, W = 2, 4, 16, 16
    Cout, K = 8, 3

    x = jax.random.normal(k_x, (N, Cin, H, W), dtype=jnp.float32)
    w = jax.random.normal(k_w, (Cout, Cin, K, K), dtype=jnp.float32) * 0.1
    bias = jax.random.normal(k_b, (Cout,), dtype=jnp.float32) * 0.1
    gamma = 1.0 + 0.1 * jax.random.normal(k_g, (Cout,), dtype=jnp.float32)
    beta = 0.1 * jax.random.normal(k_be, (Cout,), dtype=jnp.float32)

    # Config 1: relu, dilation 1
    out = conv_block(x, w, bias, gamma, beta, activation="relu",
                     kernel_size=K, dilation_rate=1)
    out = jax.block_until_ready(out)
    ref = conv_block_ref(x, w, bias, gamma, beta, activation="relu",
                         dilation_rate=1)
    assert out.shape == (N, Cout, H, W)
    assert jnp.allclose(out, ref, atol=1e-4, rtol=1e-4), "mismatch (relu, d=1)"

    # Config 2: leaky_relu, dilation 2
    out2 = conv_block(x, w, bias, gamma, beta, activation="leaky_relu",
                      kernel_size=K, dilation_rate=2)
    out2 = jax.block_until_ready(out2)
    ref2 = conv_block_ref(x, w, bias, gamma, beta, activation="leaky_relu",
                          dilation_rate=2)
    assert jnp.allclose(out2, ref2, atol=1e-4, rtol=1e-4), "mismatch (leaky, d=2)"

    print("KERNEL_OK")
</pallas_src>

<mosaic_0001>
module attributes {stable_mosaic.version = 11 : i64} {
  func.func @conv_kernel(%arg0: i32, %arg1: i32, %arg2: memref<1x18x18x4xf32, #tpu.memory_space<vmem>>, %arg3: memref<36x8xf32, #tpu.memory_space<vmem>>, %arg4: memref<1x8x16x8xf32, #tpu.memory_space<vmem>>, %arg5: memref<1x1x1x8xf32, #tpu.memory_space<vmem>>, %arg6: memref<1x1x1x8xf32, #tpu.memory_space<vmem>>) attributes {dimension_semantics = [#tpu.dimension_semantics<parallel>, #tpu.dimension_semantics<parallel>], iteration_bounds = array<i64: 2, 2>, scalar_prefetch = 0 : i64, scratch_operands = 0 : i64, tpu.core_type = #tpu.core_type<tc>, window_params = [{transform_indices = @transform_0, window_bounds = array<i64: 1, 18, 18, 4>}, {pipeline_mode = #tpu.pipeline_mode<synchronous>, transform_indices = @transform_1, window_bounds = array<i64: 36, 8>}, {transform_indices = @transform_2, window_bounds = array<i64: 1, 8, 16, 8>}, {transform_indices = @transform_3, window_bounds = array<i64: 1, 1, 1, 8>}, {transform_indices = @transform_4, window_bounds = array<i64: 1, 1, 1, 8>}]} {
    %c8_i32 = arith.constant 8 : i32
    %0 = arith.muli %arg1, %c8_i32 : i32
    %c0 = arith.constant 0 : index
    %1 = arith.index_cast %0 : i32 to index
    %c0_0 = arith.constant 0 : index
    %c0_1 = arith.constant 0 : index
    %2 = vector.load %arg2[%c0, %1, %c0_0, %c0_1] : memref<1x18x18x4xf32, #tpu.memory_space<vmem>>, vector<1x10x18x4xf32>
    %3 = vector.shape_cast %2 : vector<1x10x18x4xf32> to vector<10x18x4xf32>
    %4 = vector.extract_strided_slice %3 {offsets = [0, 0, 0], sizes = [8, 16, 4], strides = [1, 1, 1]} : vector<10x18x4xf32> to vector<8x16x4xf32>
    %5 = vector.shape_cast %4 : vector<8x16x4xf32> to vector<128x4xf32>
    %6 = vector.extract_strided_slice %3 {offsets = [0, 1, 0], sizes = [8, 16, 4], strides = [1, 1, 1]} : vector<10x18x4xf32> to vector<8x16x4xf32>
    %7 = vector.shape_cast %6 : vector<8x16x4xf32> to vector<128x4xf32>
    %8 = vector.extract_strided_slice %3 {offsets = [0, 2, 0], sizes = [8, 16, 4], strides = [1, 1, 1]} : vector<10x18x4xf32> to vector<8x16x4xf32>
    %9 = vector.shape_cast %8 : vector<8x16x4xf32> to vector<128x4xf32>
    %10 = vector.extract_strided_slice %3 {offsets = [1, 0, 0], sizes = [8, 16, 4], strides = [1, 1, 1]} : vector<10x18x4xf32> to vector<8x16x4xf32>
    %11 = vector.shape_cast %10 : vector<8x16x4xf32> to vector<128x4xf32>
    %12 = vector.extract_strided_slice %3 {offsets = [1, 1, 0], sizes = [8, 16, 4], strides = [1, 1, 1]} : vector<10x18x4xf32> to vector<8x16x4xf32>
    %13 = vector.shape_cast %12 : vector<8x16x4xf32> to vector<128x4xf32>
    %14 = vector.extract_strided_slice %3 {offsets = [1, 2, 0], sizes = [8, 16, 4], strides = [1, 1, 1]} : vector<10x18x4xf32> to vector<8x16x4xf32>
    %15 = vector.shape_cast %14 : vector<8x16x4xf32> to vector<128x4xf32>
    %16 = vector.extract_strided_slice %3 {offsets = [2, 0, 0], sizes = [8, 16, 4], strides = [1, 1, 1]} : vector<10x18x4xf32> to vector<8x16x4xf32>
    %17 = vector.shape_cast %16 : vector<8x16x4xf32> to vector<128x4xf32>
    %18 = vector.extract_strided_slice %3 {offsets = [2, 1, 0], sizes = [8, 16, 4], strides = [1, 1, 1]} : vector<10x18x4xf32> to vector<8x16x4xf32>
    %19 = vector.shape_cast %18 : vector<8x16x4xf32> to vector<128x4xf32>
    %20 = vector.extract_strided_slice %3 {offsets = [2, 2, 0], sizes = [8, 16, 4], strides = [1, 1, 1]} : vector<10x18x4xf32> to vector<8x16x4xf32>
    %21 = vector.shape_cast %20 : vector<8x16x4xf32> to vector<128x4xf32>
    %22 = tpu.concatenate %5, %7, %9, %11, %13, %15, %17, %19, %21 in 1 : vector<128x4xf32>, vector<128x4xf32>, vector<128x4xf32>, vector<128x4xf32>, vector<128x4xf32>, vector<128x4xf32>, vector<128x4xf32>, vector<128x4xf32>, vector<128x4xf32> -> vector<128x36xf32>
    %c0_2 = arith.constant 0 : index
    %c0_3 = arith.constant 0 : index
    %23 = vector.load %arg3[%c0_2, %c0_3] : memref<36x8xf32, #tpu.memory_space<vmem>>, vector<36x8xf32>
    %cst = arith.constant dense<0.000000e+00> : vector<128x8xf32>
    %24 = tpu.matmul %22, %23, %cst {dimension_numbers = #tpu.dot_dimension_numbers<[1], [0], [0], [1], [0, 0, 1, 1], [], []>} : vector<128x36xf32>, vector<36x8xf32>, vector<128x8xf32> -> vector<128x8xf32>
    %25 = vector.shape_cast %24 : vector<128x8xf32> to vector<8x16x8xf32>
    %c0_4 = arith.constant 0 : index
    %c0_5 = arith.constant 0 : index
    %c0_6 = arith.constant 0 : index
    %c0_7 = arith.constant 0 : index
    %26 = vector.load %arg4[%c0_4, %c0_5, %c0_6, %c0_7] : memref<1x8x16x8xf32, #tpu.memory_space<vmem>>, vector<1x8x16x8xf32>
    %27 = vector.shape_cast %26 : vector<1x8x16x8xf32> to vector<8x16x8xf32>
    %28 = vector.shape_cast %25 : vector<8x16x8xf32> to vector<1x8x16x8xf32>
    tpu.vector_store %arg4[%c0_4, %c0_5, %c0_6, %c0_7], %28 {strides = array<i32>} : memref<1x8x16x8xf32, #tpu.memory_space<vmem>>, vector<1x8x16x8xf32>,
    %cst_8 = arith.constant dense<0.000000e+00> : vector<8xf32>
    %29 = vector.multi_reduction <add>, %24, %cst_8 [0] : vector<128x8xf32> to vector<8xf32>
    %30 = vector.shape_cast %29 : vector<8xf32> to vector<1x8xf32>
    %c0_9 = arith.constant 0 : index
    %c0_10 = arith.constant 0 : index
    %c0_11 = arith.constant 0 : index
    %c0_12 = arith.constant 0 : index
    %31 = vector.load %arg5[%c0_9, %c0_10, %c0_11, %c0_12] : memref<1x1x1x8xf32, #tpu.memory_space<vmem>>, vector<1x1x1x8xf32>
    %32 = vector.shape_cast %31 : vector<1x1x1x8xf32> to vector<1x8xf32>
    %33 = vector.shape_cast %30 : vector<1x8xf32> to vector<1x1x1x8xf32>
    tpu.vector_store %arg5[%c0_9, %c0_10, %c0_11, %c0_12], %33 {strides = array<i32>} : memref<1x1x1x8xf32, #tpu.memory_space<vmem>>, vector<1x1x1x8xf32>,
    %34 = arith.mulf %24, %24 : vector<128x8xf32>
    %cst_13 = arith.constant dense<0.000000e+00> : vector<8xf32>
    %35 = vector.multi_reduction <add>, %34, %cst_13 [0] : vector<128x8xf32> to vector<8xf32>
    %36 = vector.shape_cast %35 : vector<8xf32> to vector<1x8xf32>
    %c0_14 = arith.constant 0 : index
    %c0_15 = arith.constant 0 : index
    %c0_16 = arith.constant 0 : index
    %c0_17 = arith.constant 0 : index
    %37 = vector.load %arg6[%c0_14, %c0_15, %c0_16, %c0_17] : memref<1x1x1x8xf32, #tpu.memory_space<vmem>>, vector<1x1x1x8xf32>
    %38 = vector.shape_cast %37 : vector<1x1x1x8xf32> to vector<1x8xf32>
    %39 = vector.shape_cast %36 : vector<1x8xf32> to vector<1x1x1x8xf32>
    tpu.vector_store %arg6[%c0_14, %c0_15, %c0_16, %c0_17], %39 {strides = array<i32>} : memref<1x1x1x8xf32, #tpu.memory_space<vmem>>, vector<1x1x1x8xf32>,
    return
  }
  func.func @transform_0(%arg0: i32, %arg1: i32) -> (i32, i32, i32, i32) {
    %c0_i32 = arith.constant 0 : i32
    %c0_i32_0 = arith.constant 0 : i32
    %c0_i32_1 = arith.constant 0 : i32
    %c0_i32_2 = arith.constant 0 : i32
    return %arg0, %c0_i32, %c0_i32_0, %c0_i32_1 : i32, i32, i32, i32
  }
  func.func @transform_1(%arg0: i32, %arg1: i32) -> (i32, i32) {
    %c0_i32 = arith.constant 0 : i32
    %c0_i32_0 = arith.constant 0 : i32
    %c0_i32_1 = arith.constant 0 : i32
    return %c0_i32, %c0_i32_0 : i32, i32
  }
  func.func @transform_2(%arg0: i32, %arg1: i32) -> (i32, i32, i32, i32) {
    %c0_i32 = arith.constant 0 : i32
    %c0_i32_0 = arith.constant 0 : i32
    %c0_i32_1 = arith.constant 0 : i32
    return %arg0, %arg1, %c0_i32, %c0_i32_0 : i32, i32, i32, i32
  }
  func.func @transform_3(%arg0: i32, %arg1: i32) -> (i32, i32, i32, i32) {
    %c0_i32 = arith.constant 0 : i32
    %c0_i32_0 = arith.constant 0 : i32
    %c0_i32_1 = arith.constant 0 : i32
    return %arg0, %arg1, %c0_i32, %c0_i32_0 : i32, i32, i32, i32
  }
  func.func @transform_4(%arg0: i32, %arg1: i32) -> (i32, i32, i32, i32) {
    %c0_i32 = arith.constant 0 : i32
    %c0_i32_0 = arith.constant 0 : i32
    %c0_i32_1 = arith.constant 0 : i32
    return %arg0, %arg1, %c0_i32, %c0_i32_0 : i32, i32, i32, i32
  }
}

</mosaic_0001>

<bundles_post_ra>
// kernel: tpu_custom_call.1
= control target key start
LH: loop header
LB: loop body
LE: loop exit
PB: predicated region body
PF: predicated region fallthrough
CT: control target
= control target key end

     0   :  { %10 = vsyncpa [#allocation3], 0  ;;  %s2639_s0 = inlined_call_operand.vmem [shape: f32[2,18,18,4], index: 0, kind: input, shape index: {}]   ;;  %s2640_s1 = inlined_call_operand.vmem [shape: f32[36,8], index: 1, kind: input, shape index: {}]   ;;  %s2641_s2 = inlined_call_operand.vmem [shape: f32[2,16,16,8], index: 2, kind: output, shape index: {0}]   ;;  %s2642_s3 = inlined_call_operand.hbm [shape: f32[2,2,1,8], index: 3, kind: output, shape index: {1}]   ;;  %s2643_s4 = inlined_call_operand.hbm [shape: f32[2,2,1,8], index: 4, kind: output, shape index: {2}]  }
   0x1   :  { %12 = vsyncpa [#allocation3 + $0x1], 0 }
   0x2   :  { %13 = vsyncpa [#allocation5], 0 }
   0x3   :  { %15 = vsyncpa [#allocation5 + $0x1], 0  ;;  %s1647_s15 = smov 0   ;;  %s1649_s16 = smov 0  }
   0x4   :  { %s1651_s17 = smov 0   ;;  %s1653_s18 = smov 0  }
   0x5   :  { %s1655_s19 = smov 0   ;;  %s1657_s20 = smov 0  }
   0x6   :  { %s1659_s21 = smov 0   ;;  %s1661_s22 = smov 0  }
   0x7 LB: > { %s1353_s23 = sadd.s32 4294967295, %s1612_s22   ;;  %s1354_s24 = sadd.s32 4294967294, %s1612_s22   ;;  %s1612_s22 = sphi %s1661_s22, %s21_s22   ;;  %s1608_s21 = sphi %s1659_s21, %s2652_s21   ;;  %s1604_s20 = sphi %s1657_s20, %s2651_s20   ;;  %s1600_s19 = sphi %s1655_s19, %s2650_s19   ;;  %s1596_s18 = sphi %s1653_s18, %s2649_s18   ;;  %s1592_s17 = sphi %s1651_s17, %s2648_s17   ;;  %s1588_s16 = sphi %s1649_s16, %s2647_s16   ;;  %s1584_s15 = sphi %s1647_s15, %s2646_s15  }
   0x8   : > { %s30_s25 = sadd.s32 1, %s1604_s20  ;;  %s33_s26 = sadd.s32 1, %s1608_s21 }
   0x9   : > { %p31_p0 = scmp.ge.s32.totalorder %s30_s25, 2  ;;  %p127_p1 = scmp.ne.s32.totalorder %s1592_s17, %s1588_s16 }
   0xa   : > { %p128_p2 = scmp.eq.s32.totalorder %s1353_s23, 3  ;;  %p133_p5 = scmp.ne.s32.totalorder %s1588_s16, %s1584_s15 }
   0xb   : > { %s2654_s25 = smov (%p31_p0, %s30_s25), 0  ;;  %s2656_s26 = smov (!%p31_p0, %s33_s26), %s1608_s21 }
   0xc   : > { %s113_s27 = ssub.s32 %s1604_s20, %s2654_s25  ;;  %p1698_p3 = por %p128_p2, %p127_p1 }
   0xd   : > { %p35_p4 = scmp.ge.s32.totalorder %s2656_s26, 2  ;;  %p134_p6 = scmp.eq.s32.totalorder %s1354_s24, 3 }
   0xe   : > { %p1357_p7 = scmp.ge.s32.totalorder %s1612_s22, 1  ;;  %p191_p9 = scmp.lt.s32.totalorder %s1612_s22, 5 }
   0xf   : > { %s2658_s26 = smov (%p35_p4, %s2656_s26), 0  ;;  %p1707_p8 = por %p134_p6, %p133_p5 }
  0x10   : > { %s112_s30 = ssub.s32 %s1608_s21, %s2658_s26  ;;  %s117_s5 = sadd.s32 1, %s1592_s17 }
  0x11   : > { %s114_s6 = sor.u32 %s113_s27, %s112_s30  ;;  %p192_p10 = pnand %p1357_p7, %p191_p9 }
  0x12   : > { %p115_p11 = scmp.eq.s32.totalorder %s114_s6, 0  ;;  %p230_p12 = scmp.lt.s32.totalorder (!%p192_p10), %s1600_s19, 1 }
  0x13   : > { %195 = sbr.rel (%p192_p10) target bundleno = 650 (0x28a), region = 28  ;;  %s1614_s23 = smov (!%p192_p10), 4  }
  0x14   : > { %s1716_s7 = scalar_select %p115_p11, %s1592_s17, %s117_s5  }
  0x15   : > { %s1364_s9 = smul.u32 (!%p192_p10), 192, %s1596_s18  ;;  %s1615_s24 = smov (!%p192_p10), 8  }
  0x16   : > { %s1616_s27 = smov (!%p192_p10), 12   ;;  %s1617_s30 = smov (!%p192_p10), 20  }
  0x17   : > { %s1618_s5 = smov (!%p192_p10), 16   ;;  %s1619_s6 = smov (!%p192_p10), 32  }
  0x18   : > { %s1720_s8 = scalar_select %p230_p12, %s1600_s19, 1  ;;  %vm303_vm0 = vcmask 1046528   ;;  %vm344_vm1 = vcmask 1045504   ;;  %vm812_vm2 = vcmask 64512   ;;  %vm795_vm3 = vcmask 31744  }
  0x19   : > { %vm829_vm4 = vcmask 97280   ;;  %vm985_vm5 = vcmask 1043456   ;;  %vm846_vm6 = vcmask 130048   ;;  %vm863_vm7 = vcmask 162816   ;;  %s2558_s11 = sand.u32 1, %s1588_s16  }
  0x1a   : > { %s1401_s10 = smul.u32 432, %s1720_s8  ;;  %vm880_vm8 = vcmask 195584   ;;  %vm897_vm9 = vcmask 228352   ;;  %vm914_vm10 = vcmask 261120   ;;  %vm936_vm11 = vcmask 293888  }
  0x1b   : > { %vm1107_vm12 = vcmask 57344  }
  0x1c   : > { %s234_s13 = scalar_lea.vmem %s2639_s0, %s1401_s10  ;;  %s1621_s10 = smov 24  }
  0x1d   : > { %s1727_s14 = scalar_lea.vmem %s234_s13, %s1364_s9  ;;  %s1620_s9 = smov 28  }
  0x1e   : > { %v1730_v0 = vld [vmem:[%s1727_s14 + $0x30] sm:$0xff]  ;;  %v1733_v1 = vld [vmem:[%s1727_s14 + $0x38] sm:$0xff]  ;;  %v1741_v5 = vld [vmem:[%s1727_s14 + $0x20] sm:$0xff] }
  0x1f   : > { %v1736_v2 = vld [vmem:[%s1727_s14 + $0x18] sm:$0xff]  ;;  %v314_v3 = vrot.slane %v1730_v0, 1  ;;  %v315_v4 = vrot.slane %v1733_v1, 1  ;;  %v1745_v7 = vld [vmem:[%s1727_s14] sm:$0xff]  ;;  %v1748_v8 = vld [vmem:[%s1727_s14 + $0x8] sm:$0xff]  ;;  %v310_v9 = vrot.slane %v1741_v5, 1 }
  0x20   : > { %v309_v6 = vrot.slane %v1736_v2, 1  ;;  %v304_v10 = vrot.slane %v1745_v7, 1  ;;  %v305_v11 = vrot.slane %v1748_v8, 1  ;;  %v1754_v12 = vld [vmem:[%s1727_s14 + $0x40] sm:$0x3]  ;;  %v1788_v25 = vld [vmem:[%s1727_s14 + $0x68] sm:$0xff] }
  0x21   : > { %v1757_v13 = vsel %vm303_vm0, %v314_v3, %v315_v4  ;;  %v1760_v14 = vld [vmem:[%s1727_s14 + $0x28] sm:$0x3]  ;;  %v1763_v15 = vld [vmem:[%s1727_s14 + $0x10] sm:$0x3]  ;;  %v317_v18 = vrot.slane %v1754_v12, 1  ;;  %v1785_v24 = vld [vmem:[%s1727_s14 + $0x60] sm:$0xff] }
  0x22   : > { %419 = vrot.lane.b32.xlu2 %v1757_v13, %s1614_s23  ;;  %v1768_v16 = vsel %vm303_vm0, %v309_v6, %v310_v9  ;;  %v306_v17 = vsel %vm303_vm0, %v304_v10, %v305_v11  ;;  %v312_v19 = vrot.slane %v1760_v14, 1  ;;  %v307_v20 = vrot.slane %v1763_v15, 1  ;;  %v1791_v26 = vld [vmem:[%s1727_s14 + $0x50] sm:$0xff]  ;;  %v1794_v27 = vld [vmem:[%s1727_s14 + $0x58] sm:$0x3]  ;;  %v1797_v28 = vld [vmem:[%s1727_s14 + $0x48] sm:$0xff] }
  0x23   : > { %415 = vrot.lane.b32.xlu1 %v1768_v16, %s1614_s23  ;;  %411 = vrot.lane.b32.xlu0 %v306_v17, %s1614_s23  ;;  %v1778_v21 = vsel %vm303_vm0, %v315_v4, %v317_v18  ;;  %v324_v29 = vrot.slane %v1785_v24, 1  ;;  %v325_v30 = vrot.slane %v1788_v25, 1  ;;  %v320_v31 = vrot.slane %v1791_v26, 1  ;;  %v1819_v37 = vld [vmem:[%s1727_s14 + $0x80] sm:$0xff]  ;;  %v1822_v38 = vld [vmem:[%s1727_s14 + $0x88] sm:$0x3] }
  0x24   : > { %v1781_v22 = vsel %vm303_vm0, %v310_v9, %v312_v19  ;;  %v308_v23 = vsel %vm303_vm0, %v305_v11, %v307_v20  ;;  %v322_v32 = vrot.slane %v1794_v27, 1  ;;  %v319_v33 = vrot.slane %v1797_v28, 1  ;;  %v1825_v39 = vld [vmem:[%s1727_s14 + $0x78] sm:$0xff]  ;;  %v1828_v40 = vld [vmem:[%s1727_s14 + $0x70] sm:$0x3]  ;;  %v1850_v48 = vld [vmem:[%s1727_s14 + $0xa8] sm:$0xff] }
  0x25   : > { %v1810_v34 = vsel %vm303_vm0, %v324_v29, %v325_v30  ;;  %v330_v41 = vrot.slane %v1819_v37, 1  ;;  %v332_v42 = vrot.slane %v1822_v38, 1  ;;  %v329_v43 = vrot.slane %v1825_v39, 1  ;;  %v1853_v49 = vld [vmem:[%s1727_s14 + $0xb0] sm:$0xff]  ;;  %v1856_v50 = vld [vmem:[%s1727_s14 + $0x98] sm:$0xff] }
  0x26   : > { %v1813_v35 = vsel %vm303_vm0, %v320_v31, %v322_v32  ;;  %v1816_v36 = vsel %vm303_vm0, %v319_v33, %v320_v31  ;;  %v327_v44 = vrot.slane %v1828_v40, 1  ;;  %v1859_v51 = vld [vmem:[%s1727_s14 + $0xa0] sm:$0x3]  ;;  %v1862_v52 = vld [vmem:[%s1727_s14 + $0x90] sm:$0xff]  ;;  %v339_v53 = vrot.slane %v1850_v48, 1 }
  0x27   : > { %v1841_v45 = vsel %vm303_vm0, %v330_v41, %v332_v42  ;;  %v1844_v46 = vsel %vm303_vm0, %v329_v43, %v330_v41  ;;  %v340_v54 = vrot.slane %v1853_v49, 1  ;;  %v335_v55 = vrot.slane %v1856_v50, 1  ;;  %v1885_v61 = vld [vmem:[%s1727_s14 + $0xb8] sm:$0x3] }
  0x28   : > { %v1847_v47 = vsel %vm303_vm0, %v325_v30, %v327_v44  ;;  %v337_v56 = vrot.slane %v1859_v51, 1  ;;  %v334_v57 = vrot.slane %v1862_v52, 1  ;;  %v346_v62 = vrot.slane %v1748_v8, 2 }
  0x29   : > { %v1876_v58 = vsel %vm303_vm0, %v339_v53, %v340_v54  ;;  %v348_v63 = vrot.slane %v1763_v15, 2  ;;  %v345_v3 = vrot.slane %v1745_v7, 2  ;;  %v342_v4 = vrot.slane %v1885_v61, 1 }
  0x2a   : > { %421 = vrot.lane.b32.xlu2 %v1778_v21, %s1614_s23  ;;  %v1879_v59 = vsel %vm303_vm0, %v335_v55, %v337_v56  ;;  %v1882_v60 = vsel %vm303_vm0, %v334_v57, %v335_v55  ;;  %v355_v11 = vrot.slane %v1730_v0, 2  ;;  %v356_v15 = vrot.slane %v1733_v1, 2 }
  0x2b   : > { %417 = vrot.lane.b32.xlu1 %v1781_v22, %s1614_s23  ;;  %413 = vrot.lane.b32.xlu0 %v308_v23, %s1614_s23  ;;  %v349_v6 = vsel %vm344_vm1, %v346_v62, %v348_v63  ;;  %v347_v9 = vsel %vm344_vm1, %v345_v3, %v346_v62  ;;  %v1900_v10 = vsel %vm303_vm0, %v340_v54, %v342_v4  ;;  %v351_v17 = vrot.slane %v1741_v5, 2 }
  0x2c   : > { %v353_v18 = vrot.slane %v1760_v14, 2  ;;  %v350_v19 = vrot.slane %v1736_v2, 2  ;;  %v1912_v20 = vsel %vm344_vm1, %v355_v11, %v356_v15  ;;  %v361_v14 = vrot.slane %v1791_v26, 2 }
  0x2d   : > { %v363_v30 = vrot.slane %v1794_v27, 2  ;;  %v360_v31 = vrot.slane %v1797_v28, 2  ;;  %v358_v32 = vrot.slane %v1754_v12, 2  ;;  %v370_v12 = vrot.slane %v1825_v39, 2 }
  0x2e   : > { %v1915_v23 = vsel %vm344_vm1, %v351_v17, %v353_v18  ;;  %v1918_v29 = vsel %vm344_vm1, %v350_v19, %v351_v17  ;;  %v371_v27 = vrot.slane %v1819_v37, 2  ;;  %v366_v43 = vrot.slane %v1788_v25, 2 }
  0x2f   : > { %v1931_v33 = vsel %vm344_vm1, %v361_v14, %v363_v30  ;;  %v1934_v41 = vsel %vm344_vm1, %v360_v31, %v361_v14  ;;  %v1937_v42 = vsel %vm344_vm1, %v356_v15, %v358_v32  ;;  %v368_v44 = vrot.slane %v1828_v40, 2  ;;  %v2017_v31 = vld [vmem:[%s1727_s14 + $0xc8] sm:$0xff]  ;;  %v2020_v32 = vld [vmem:[%s1727_s14 + $0xc0] sm:$0xff] }
  0x30   : > { %v365_v53 = vrot.slane %v1785_v24, 2  ;;  %v1951_v54 = vsel %vm344_vm1, %v370_v12, %v371_v27  ;;  %v376_v40 = vrot.slane %v1856_v50, 2  ;;  %v378_v57 = vrot.slane %v1859_v51, 2 }
  0x31   : > { %v1954_v55 = vsel %vm344_vm1, %v366_v43, %v368_v44  ;;  %v375_v62 = vrot.slane %v1862_v52, 2  ;;  %v373_v63 = vrot.slane %v1822_v38, 2  ;;  %v381_v38 = vrot.slane %v1853_v49, 2 }
  0x32   : > { %427 = vrot.lane.b32.xlu2 %v1810_v34, %s1614_s23  ;;  %v1957_v56 = vsel %vm344_vm1, %v365_v53, %v366_v43  ;;  %v1970_v3 = vsel %vm344_vm1, %v376_v40, %v378_v57  ;;  %v383_v51 = vrot.slane %v1885_v61, 2 }
  0x33   : > { %425 = vrot.lane.b32.xlu1 %v1813_v35, %s1614_s23  ;;  %423 = vrot.lane.b32.xlu0 %v1816_v36, %s1614_s23  ;;  %v1973_v4 = vsel %vm344_vm1, %v375_v62, %v376_v40 }
  0x34   : > { %v1988_v11 = vsel %vm344_vm1, %v381_v38, %v383_v51 }
  0x3a   : > { %433 = vrot.lane.b32.xlu2 %v1841_v45, %s1614_s23 }
  0x3b   : > { %431 = vrot.lane.b32.xlu1 %v1844_v46, %s1614_s23  ;;  %429 = vrot.lane.b32.xlu0 %v1847_v47, %s1614_s23 }
  0x42   : > { %439 = vrot.lane.b32.xlu2 %v1876_v58, %s1614_s23 }
  0x43   : > { %437 = vrot.lane.b32.xlu1 %v1879_v59, %s1614_s23  ;;  %435 = vrot.lane.b32.xlu0 %v1882_v60, %s1614_s23 }
  0x4a   : > { %461 = vrot.lane.b32.xlu2 %v349_v6, %s1615_s24  ;;  %v1976_v6 = vsel %vm344_vm1, %v371_v27, %v373_v63 }
  0x4b   : > { %459 = vrot.lane.b32.xlu1 %v347_v9, %s1615_s24  ;;  %441 = vrot.lane.b32.xlu0 %v1900_v10, %s1614_s23  ;;  %v380_v9 = vrot.slane %v1850_v48, 2 }
  0x4d   : > { %v1991_v15 = vsel %vm344_vm1, %v380_v9, %v381_v38 }
  0x52   : > { %467 = vrot.lane.b32.xlu2 %v1912_v20, %s1615_s24 }
  0x53   : > { %465 = vrot.lane.b32.xlu1 %v1915_v23, %s1615_s24  ;;  %463 = vrot.lane.b32.xlu0 %v1918_v29, %s1615_s24 }
  0x5a   : > { %473 = vrot.lane.b32.xlu2 %v1931_v33, %s1615_s24 }
  0x5b   : > { %471 = vrot.lane.b32.xlu1 %v1934_v41, %s1615_s24  ;;  %469 = vrot.lane.b32.xlu0 %v1937_v42, %s1615_s24 }
  0x62   : > { %479 = vrot.lane.b32.xlu2 %v1951_v54, %s1615_s24 }
  0x63   : > { %477 = vrot.lane.b32.xlu1 %v1954_v55, %s1615_s24  ;;  %475 = vrot.lane.b32.xlu0 %v1957_v56, %s1615_s24 }
  0x6a   : > { %485 = vrot.lane.b32.xlu2 %v1970_v3, %s1615_s24 }
  0x6b   : > { %483 = vrot.lane.b32.xlu1 %v1973_v4, %s1615_s24  ;;  %481 = vrot.lane.b32.xlu0 %v1976_v6, %s1615_s24 }
  0x72   : > { %507 = vrot.lane.b32.xlu2 %v1736_v2, %s1616_s27 }
  0x73   : > { %489 = vrot.lane.b32.xlu1 %v1988_v11, %s1615_s24  ;;  %487 = vrot.lane.b32.xlu0 %v1991_v15, %s1615_s24 }
  0x7a   : > { %513 = vrot.lane.b32.xlu2 %v1733_v1, %s1616_s27 }
  0x7b   : > { %511 = vrot.lane.b32.xlu1 %v1730_v0, %s1616_s27  ;;  %509 = vrot.lane.b32.xlu0 %v1741_v5, %s1616_s27 }
  0x7c   : > { %v420_v61 = vpop.permute.xlu2 %419 }
  0x82   : > { %519 = vrot.lane.b32.xlu2 %v1785_v24, %s1616_s27 }
  0x83   : > { %517 = vrot.lane.b32.xlu1 %v1791_v26, %s1616_s27  ;;  %515 = vrot.lane.b32.xlu0 %v1797_v28, %s1616_s27 }
  0x84   : > { %v2004_v17 = vpop.permute.xlu2 %421 }
  0x8a   : > { %525 = vrot.lane.b32.xlu2 %v1819_v37, %s1616_s27 }
  0x8b   : > { %523 = vrot.lane.b32.xlu1 %v1825_v39, %s1616_s27  ;;  %521 = vrot.lane.b32.xlu0 %v1788_v25, %s1616_s27 }
  0x8c   : > { %v2009_v18 = vpop.permute.xlu2 %427 }
  0x92   : > { %531 = vrot.lane.b32.xlu2 %v1850_v48, %s1616_s27 }
  0x93   : > { %529 = vrot.lane.b32.xlu1 %v1856_v50, %s1616_s27  ;;  %527 = vrot.lane.b32.xlu0 %v1862_v52, %s1616_s27 }
  0x94   : > { %v2014_v19 = vpop.permute.xlu2 %433 }
  0x95   : > { %v416_v14 = vpop.permute.xlu1 %415  ;;  %v412_v30 = vpop.permute.xlu0 %411 }
  0x9a   : > { %537 = vrot.lane.b32.xlu2 %v2017_v31, %s1616_s27 }
  0x9b   : > { %535 = vrot.lane.b32.xlu1 %v2020_v32, %s1616_s27  ;;  %533 = vrot.lane.b32.xlu0 %v1853_v49, %s1616_s27 }
  0x9c   : > { %v2025_v12 = vpop.permute.xlu2 %439 }
  0x9d   : > { %v418_v27 = vpop.permute.xlu1 %417  ;;  %v414_v43 = vpop.permute.xlu0 %413 }
  0x9e   : > { %v797_v44 = vsel %vm795_vm3, %v1748_v8, %v414_v43  ;;  %v800_v8 = vsel %vm795_vm3, %v1730_v0, %v420_v61 }
  0xa2   : > { %603 = vrot.lane.b32.xlu2 %v1918_v29, %s1617_s30 }
  0xa3   : > { %557 = vrot.lane.b32.xlu1 %v1781_v22, %s1618_s5  ;;  %555 = vrot.lane.b32.xlu0 %v1768_v16, %s1618_s5 }
  0xa4   : > { %v462_v53 = vpop.permute.xlu2 %461 }
  0xa5   : > { %v426_v40 = vpop.permute.xlu1 %425  ;;  %v2036_v57 = vsel %vm812_vm2, %v797_v44, %v462_v53  ;;  %v424_v62 = vpop.permute.xlu0 %423  ;;  %v796_v44 = vsel %vm795_vm3, %v1745_v7, %v412_v30  ;;  %v798_v30 = vsel %vm795_vm3, %v1736_v2, %v416_v14 }
  0xa6   : > { %v803_v38 = vsel %vm795_vm3, %v1791_v26, %v426_v40  ;;  %v802_v14 = vsel %vm795_vm3, %v1797_v28, %v424_v62 }
  0xaa   : > { %747 = vrot.lane.b32.xlu2 %v1912_v20, %s1619_s6 }
  0xab   : > { %699 = vrot.lane.b32.xlu1 %v1757_v13, %s1620_s9  ;;  %651 = vrot.lane.b32.xlu0 %v1730_v0, %s1621_s10 }
  0xac   : > { %v468_v16 = vpop.permute.xlu2 %467 }
  0xad   : > { %v432_v22 = vpop.permute.xlu1 %431  ;;  %v2047_v29 = vsel %vm812_vm2, %v800_v8, %v468_v16  ;;  %v430_v63 = vpop.permute.xlu0 %429 }
  0xae   : > { %v805_v62 = vsel %vm795_vm3, %v1788_v25, %v430_v63 }
  0xb2   : > { %611 = vrot.lane.b32.xlu2 %v1934_v41, %s1617_s30 }
  0xb3   : > { %605 = vrot.lane.b32.xlu1 %v1915_v23, %s1617_s30  ;;  %563 = vrot.lane.b32.xlu0 %v1816_v36, %s1618_s5  ;;  %v806_v23 = vsel %vm795_vm3, %v1825_v39, %v432_v22 }
  0xb4   : > { %v474_v51 = vpop.permute.xlu2 %473 }
  0xb5   : > { %v438_v0 = vpop.permute.xlu1 %437  ;;  %v2058_v9 = vsel %vm812_vm2, %v803_v38, %v474_v51  ;;  %v436_v61 = vpop.permute.xlu0 %435  ;;  %v799_v38 = vsel %vm795_vm3, %v1741_v5, %v418_v27  ;;  %v801_v5 = vsel %vm795_vm3, %v1733_v1, %v2004_v17  ;;  %v804_v17 = vsel %vm795_vm3, %v1785_v24, %v2009_v18 }
  0xb6   : > { %v809_v22 = vsel %vm795_vm3, %v1856_v50, %v438_v0  ;;  %v807_v18 = vsel %vm795_vm3, %v1819_v37, %v2014_v19  ;;  %v808_v63 = vsel %vm795_vm3, %v1862_v52, %v436_v61  ;;  %v810_v19 = vsel %vm795_vm3, %v1850_v48, %v2025_v12 }
  0xba   : > { %659 = vrot.lane.b32.xlu2 %v1785_v24, %s1621_s10 }
  0xbb   : > { %653 = vrot.lane.b32.xlu1 %v1733_v1, %s1621_s10  ;;  %571 = vrot.lane.b32.xlu0 %v1844_v46, %s1618_s5 }
  0xbc   : > { %v480_v43 = vpop.permute.xlu2 %479 }
  0xbd   : > { %v2071_v53 = vsel %vm812_vm2, %v806_v23, %v480_v43  ;;  %v460_v40 = vpop.permute.xlu1 %459  ;;  %v442_v8 = vpop.permute.xlu0 %441 }
  0xbe   : > { %v813_v16 = vsel %vm812_vm2, %v796_v44, %v460_v40  ;;  %v811_v61 = vsel %vm795_vm3, %v1853_v49, %v442_v8 }
  0xc2   : > { %707 = vrot.lane.b32.xlu2 %v1810_v34, %s1620_s9 }
  0xc3   : > { %701 = vrot.lane.b32.xlu1 %v1778_v21, %s1620_s9  ;;  %619 = vrot.lane.b32.xlu0 %v1951_v54, %s1617_s30 }
  0xc4   : > { %v486_v7 = vpop.permute.xlu2 %485 }
  0xc5   : > { %v2087_v51 = vsel %vm812_vm2, %v809_v22, %v486_v7  ;;  %v466_v23 = vpop.permute.xlu1 %465  ;;  %v464_v43 = vpop.permute.xlu0 %463 }
  0xc6   : > { %v816_v44 = vsel %vm812_vm2, %v799_v38, %v466_v23  ;;  %v815_v40 = vsel %vm812_vm2, %v798_v30, %v464_v43 }
  0xca   : > { %755 = vrot.lane.b32.xlu2 %v1957_v56, %s1619_s6 }
  0xcb   : > { %749 = vrot.lane.b32.xlu1 %v1937_v42, %s1619_s6  ;;  %667 = vrot.lane.b32.xlu0 %v1862_v52, %s1621_s10 }
  0xcc   : > { %v508_v2 = vpop.permute.xlu2 %507 }
  0xcd   : > { %v2103_v27 = vsel %vm829_vm4, %v813_v16, %v508_v2  ;;  %v472_v0 = vpop.permute.xlu1 %471  ;;  %v470_v22 = vpop.permute.xlu0 %469 }
  0xce   : > { %v819_v7 = vsel %vm812_vm2, %v802_v14, %v472_v0  ;;  %v818_v30 = vsel %vm812_vm2, %v801_v5, %v470_v22 }
  0xd2   : > { %559 = vrot.lane.b32.xlu2 %v1757_v13, %s1618_s5 }
  0xd3   : > { %763 = vrot.lane.b32.xlu1 %v1973_v4, %s1619_s6  ;;  %715 = vrot.lane.b32.xlu0 %v1882_v60, %s1620_s9 }
  0xd4   : > { %v514_v1 = vpop.permute.xlu2 %513 }
  0xd5   : > { %v2119_v16 = vsel %vm829_vm4, %v816_v44, %v514_v1  ;;  %v478_v38 = vpop.permute.xlu1 %477  ;;  %v476_v23 = vpop.permute.xlu0 %475 }
  0xd6   : > { %v822_v13 = vsel %vm812_vm2, %v805_v62, %v478_v38  ;;  %v2123_v43 = vsel %vm812_vm2, %v804_v17, %v476_v23 }
  0xda   : > { %613 = vrot.lane.b32.xlu2 %v1931_v33, %s1617_s30 }
  0xdb   : > { %607 = vrot.lane.b32.xlu1 %v1912_v20, %s1617_s30  ;;  %565 = vrot.lane.b32.xlu0 %v1813_v35, %s1618_s5 }
  0xdc   : > { %v520_v24 = vpop.permute.xlu2 %519 }
  0xdd   : > { %v2137_v44 = vsel %vm829_vm4, %v819_v7, %v520_v24  ;;  %v484_v2 = vpop.permute.xlu1 %483  ;;  %v482_v5 = vpop.permute.xlu0 %481 }
  0xde   : > { %v825_v14 = vsel %vm812_vm2, %v808_v63, %v484_v2  ;;  %v2141_v20 = vsel %vm812_vm2, %v807_v18, %v482_v5  ;;  %v388_v63 = vrot.slane %v2020_v32, 1  ;;  %v389_v2 = vrot.slane %v2017_v31, 1 }
  0xe2   : > { %655 = vrot.lane.b32.xlu2 %v1797_v28, %s1621_s10 }
  0xe3   : > { %579 = vrot.lane.b32.xlu1 %v1876_v58, %s1618_s5  ;;  %573 = vrot.lane.b32.xlu0 %v1841_v45, %s1618_s5 }
  0xe4   : > { %v526_v52 = vpop.permute.xlu2 %525 }
  0xe5   : > { %v2155_v0 = vsel %vm829_vm4, %v822_v13, %v526_v52  ;;  %v490_v22 = vpop.permute.xlu1 %489  ;;  %v488_v7 = vpop.permute.xlu0 %487 }
  0xe6   : > { %v828_v28 = vsel %vm812_vm2, %v811_v61, %v490_v22  ;;  %v2159_v1 = vsel %vm812_vm2, %v810_v19, %v488_v7  ;;  %v931_v61 = vld [vmem:[%s2640_s1] sm:$0xff]  ;;  %v2225_v22 = vsel %vm303_vm0, %v388_v63, %v389_v2  ;;  %v394_v7 = vrot.slane %v2017_v31, 2 }
  0xea   : > { %627 = vrot.lane.b32.xlu2 %v1991_v15, %s1617_s30 }
  0xeb   : > { %621 = vrot.lane.b32.xlu1 %v1976_v6, %s1617_s30  ;;  %661 = vrot.lane.b32.xlu0 %v1788_v25, %s1621_s10 }
  0xec   : > { %v532_v12 = vpop.permute.xlu2 %531 }
  0xed   : > { %v2168_v8 = vsel %vm829_vm4, %v825_v14, %v532_v12  ;;  %v512_v17 = vpop.permute.xlu1 %511  ;;  %v510_v62 = vpop.permute.xlu0 %509 }
  0xee   : > { %v2171_v38 = vsel %vm829_vm4, %v815_v40, %v512_v17  ;;  %v2175_v23 = vsel %vm829_vm4, %v2036_v57, %v510_v62  ;;  %v934_v57 = vld [vmem:[%s2640_s1 + $0x18] sm:$0xff] }
  0xf2   : > { %669 = vrot.lane.b32.xlu2 %v1856_v50, %s1621_s10  ;;  %v935_v50 = vld [vmem:[%s2640_s1 + $0x20] sm:$0xf] }
  0xf3   : > { %709 = vrot.lane.b32.xlu1 %v1847_v47, %s1620_s9  ;;  %703 = vrot.lane.b32.xlu0 %v1816_v36, %s1620_s9  ;;  %v933_v36 = vld [vmem:[%s2640_s1 + $0x10] sm:$0xff] }
  0xf4   : > { %v538_v25 = vpop.permute.xlu2 %537  ;;  %1365 = vmatpush.msk.msra.mxu0 %vm985_vm5, %v935_v50  ;;  %1386 = vmatpush.msk.msra.mxu1 %vm985_vm5, %v935_v50 }
  0xf5   : > { %v2184_v13 = vsel %vm829_vm4, %v828_v28, %v538_v25  ;;  %v518_v24 = vpop.permute.xlu1 %517  ;;  %v2186_v40 = vpop.permute.xlu0 %515  ;;  %1387 = vmatpush.msk.msra.mxu2 %vm985_vm5, %v935_v50  ;;  %1388 = vmatpush.msk.msra.mxu3 %vm985_vm5, %v935_v50 }
  0xf6   : > { %v2189_v18 = vsel %vm829_vm4, %v818_v30, %v518_v24  ;;  %1001 = vmatpush.msra.mxu0 %v934_v57  ;;  %1389 = vmatpush.msra.mxu1 %v934_v57 }
  0xf7   : > { %1390 = vmatpush.msra.mxu2 %v934_v57  ;;  %1391 = vmatpush.msra.mxu3 %v934_v57 }
  0xf8   : > { %1002 = vmatpush.msra.mxu0 %v933_v36  ;;  %1392 = vmatpush.msra.mxu1 %v933_v36 }
  0xf9   : > { %1393 = vmatpush.msra.mxu2 %v933_v36  ;;  %1394 = vmatpush.msra.mxu3 %v933_v36 }
  0xfa   : > { %757 = vrot.lane.b32.xlu2 %v1954_v55, %s1619_s6 }
  0xfb   : > { %751 = vrot.lane.b32.xlu1 %v1934_v41, %s1619_s6  ;;  %675 = vrot.lane.b32.xlu0 %v2020_v32, %s1621_s10  ;;  %v932_v41 = vld [vmem:[%s2640_s1 + $0x8] sm:$0xff] }
  0xfc   : > { %v604_v30 = vpop.permute.xlu2 %603  ;;  %1003 = vmatpush.msra.mxu0 %v932_v41  ;;  %1395 = vmatpush.msra.mxu1 %v932_v41 }
  0xfd   : > { %v524_v5 = vpop.permute.xlu1 %523  ;;  %v522_v14 = vpop.permute.xlu0 %521  ;;  %1396 = vmatpush.msra.mxu2 %v932_v41  ;;  %1397 = vmatpush.msra.mxu3 %v932_v41 }
  0xfe   : > { %v2213_v52 = vsel %vm829_vm4, %v2123_v43, %v524_v5  ;;  %v2217_v19 = vsel %vm829_vm4, %v2058_v9, %v522_v14  ;;  %1004 = vmatpush.msra.mxu0 %v931_v61  ;;  %1398 = vmatpush.msra.mxu1 %v931_v61  ;;  %v393_v43 = vrot.slane %v2020_v32, 2 }
  0xff   : > { %1399 = vmatpush.msra.mxu2 %v931_v61  ;;  %1400 = vmatpush.msra.mxu3 %v931_v61 }
 0x100   : > { %v2246_v25 = vsel %vm344_vm1, %v393_v43, %v394_v7  ;;  %v275_v43 = vld [vmem:[%s1727_s14 + $0xd0] sm:$0x3] }
 0x102   : > { %765 = vrot.lane.b32.xlu2 %v1970_v3, %s1619_s6 }
 0x103   : > { %723 = vrot.lane.b32.xlu1 %v2225_v22, %s1620_s9  ;;  %717 = vrot.lane.b32.xlu0 %v1879_v59, %s1620_s9 }
 0x104   : > { %v748_v9 = vpop.permute.xlu2 %747 }
 0x105   : > { %v530_v28 = vpop.permute.xlu1 %529  ;;  %v528_v12 = vpop.permute.xlu0 %527 }
 0x106   : > { %v2237_v17 = vsel %vm829_vm4, %v2141_v20, %v530_v28  ;;  %v2241_v62 = vsel %vm829_vm4, %v2071_v53, %v528_v12  ;;  %v391_v12 = vrot.slane %v275_v43, 1 }
 0x10a   : > { %567 = vrot.lane.b32.xlu2 %v1810_v34, %s1618_s5 }
 0x10b   : > { %561 = vrot.lane.b32.xlu1 %v1778_v21, %s1618_s5  ;;  %771 = vrot.lane.b32.xlu0 %v2246_v25, %s1619_s6 }
 0x10c   : > { %v612_v32 = vpop.permute.xlu2 %611 }
 0x10d   : > { %v536_v20 = vpop.permute.xlu1 %535  ;;  %v534_v24 = vpop.permute.xlu0 %533 }
 0x10e   : > { %v2256_v53 = vsel %vm829_vm4, %v2159_v1, %v536_v20  ;;  %v2260_v50 = vsel %vm829_vm4, %v2087_v51, %v534_v24 }
 0x112   : > { %575 = vrot.lane.b32.xlu2 %v1882_v60, %s1618_s5 }
 0x113   : > { %615 = vrot.lane.b32.xlu1 %v1957_v56, %s1617_s30  ;;  %609 = vrot.lane.b32.xlu0 %v1937_v42, %s1617_s30 }
 0x114   : > { %v660_v21 = vpop.permute.xlu2 %659 }
 0x115   : > { %v558_v34 = vpop.permute.xlu1 %557  ;;  %v556_v57 = vpop.permute.xlu0 %555 }
 0x116   : > { %v847_v1 = vsel %vm846_vm6, %v2103_v27, %v556_v57 }
 0x117   : > { %v864_v56 = vsel %vm863_vm7, %v847_v1, %v604_v30  ;;  %v834_v30 = vsel %vm829_vm4, %v2047_v29, %v2186_v40 }
 0x11a   : > { %663 = vrot.lane.b32.xlu2 %v1825_v39, %s1621_s10 }
 0x11b   : > { %657 = vrot.lane.b32.xlu1 %v1791_v26, %s1621_s10  ;;  %581 = vrot.lane.b32.xlu0 %v1900_v10, %s1618_s5 }
 0x11c   : > { %v708_v60 = vpop.permute.xlu2 %707 }
 0x11d   : > { %v700_v42 = vpop.permute.xlu1 %699  ;;  %v652_v51 = vpop.permute.xlu0 %651 }
 0x11e   : > { %v881_v27 = vsel %vm880_vm8, %v864_v56, %v652_v51 }
 0x11f   : > { %v898_v39 = vsel %vm897_vm9, %v881_v27, %v700_v42 }
 0x120   : > { %v915_v36 = vsel %vm914_vm10, %v898_v39, %v748_v9  ;;  %v276_v39 = vld [vmem:[%s1727_s14 + $0xd8] sm:$0xff] }
 0x121   : > { %1366 = vmatmul.msk.f32.vlgmr.msra.gmra.mxu0 %vm936_vm11, %v915_v36 }
 0x122   : > { %705 = vrot.lane.b32.xlu2 %v1813_v35, %s1620_s9 }
 0x123   : > { %629 = vrot.lane.b32.xlu1 %v1988_v11, %s1617_s30  ;;  %623 = vrot.lane.b32.xlu0 %v1973_v4, %s1617_s30 }
 0x124   : > { %v756_v26 = vpop.permute.xlu2 %755 }
 0x125   : > { %v606_v63 = vpop.permute.xlu1 %605  ;;  %v564_v5 = vpop.permute.xlu0 %563 }
 0x126   : > { %v851_v14 = vsel %vm846_vm6, %v834_v30, %v564_v5 }
 0x127   : > { %v868_v41 = vsel %vm863_vm7, %v851_v14, %v612_v32 }
 0x128   : > { %v885_v35 = vsel %vm880_vm8, %v868_v41, %v660_v21 }
 0x129   : > { %v902_v61 = vsel %vm897_vm9, %v885_v35, %v708_v60 }
 0x12a   : > { %677 = vrot.lane.b32.xlu2 %v2017_v31, %s1621_s10  ;;  %v919_v4 = vsel %vm914_vm10, %v902_v61, %v756_v26 }
 0x12b   : > { %671 = vrot.lane.b32.xlu1 %v1850_v48, %s1621_s10  ;;  %711 = vrot.lane.b32.xlu0 %v1844_v46, %s1620_s9  ;;  %v396_v48 = vrot.slane %v275_v43, 2 }
 0x12c   : > { %1370 = vmatmul.msk.f32.vlgmr.msra.gmra.mxu1 %vm936_vm11, %v919_v4  ;;  %v2302_v29 = vpop.permute.xlu2 %559 }
 0x12d   : > { %v654_v40 = vpop.permute.xlu1 %653  ;;  %v572_v9 = vpop.permute.xlu0 %571  ;;  %v2314_v20 = vsel %vm344_vm1, %v394_v7, %v396_v48 }
 0x132   : > { %719 = vrot.lane.b32.xlu2 %v1876_v58, %s1620_s9  ;;  %v2319_v58 = vsel %vm303_vm0, %v389_v2, %v391_v12 }
 0x133   : > { %759 = vrot.lane.b32.xlu1 %v1951_v54, %s1619_s6  ;;  %753 = vrot.lane.b32.xlu0 %v1931_v33, %s1619_s6  ;;  %v848_v54 = vsel %vm846_vm6, %v2175_v23, %v558_v34 }
 0x134   : > { %v614_v28 = vpop.permute.xlu2 %613  ;;  %v865_v33 = vsel %vm863_vm7, %v848_v54, %v606_v63 }
 0x135   : > { %v702_v46 = vpop.permute.xlu1 %701  ;;  %v620_v32 = vpop.permute.xlu0 %619  ;;  %v882_v7 = vsel %vm880_vm8, %v865_v33, %v654_v40 }
 0x136   : > { %v899_v2 = vsel %vm897_vm9, %v882_v7, %v702_v46 }
 0x13a   : > { %773 = vrot.lane.b32.xlu2 %v2314_v20, %s1619_s6 }
 0x13b   : > { %767 = vrot.lane.b32.xlu1 %v1991_v15, %s1619_s6  ;;  %725 = vrot.lane.b32.xlu0 %v2319_v58, %s1620_s9  ;;  %v855_v15 = vsel %vm846_vm6, %v2213_v52, %v572_v9  ;;  %v278_v9 = vld [vmem:[%s1727_s14 + $0xe8] sm:$0x3] }
 0x13c   : > { %v2331_v31 = vpop.permute.xlu2 %655  ;;  %v872_v34 = vsel %vm863_vm7, %v855_v15, %v620_v32  ;;  %v404_v48 = vrot.slane %v278_v9, 1 }
 0x13d   : > { %v750_v24 = vpop.permute.xlu1 %749  ;;  %v668_v21 = vpop.permute.xlu0 %667 }
 0x13e   : > { %v916_v23 = vsel %vm914_vm10, %v899_v2, %v750_v24  ;;  %v889_v1 = vsel %vm880_vm8, %v872_v34, %v668_v21 }
 0x13f   : > { %1367 = vmatmul.msk.f32.gmra.mxu0 %vm936_vm11, %v916_v23 }
 0x142   : > { %577 = vrot.lane.b32.xlu2 %v1879_v59, %s1618_s5 }
 0x143   : > { %617 = vrot.lane.b32.xlu1 %v1954_v55, %s1617_s30  ;;  %569 = vrot.lane.b32.xlu0 %v1847_v47, %s1618_s5 }
 0x144   : > { %v2345_v57 = vpop.permute.xlu2 %627 }
 0x145   : > { %v764_v60 = vpop.permute.xlu1 %763  ;;  %v716_v42 = vpop.permute.xlu0 %715 }
 0x146   : > { %v906_v59 = vsel %vm897_vm9, %v889_v1, %v716_v42 }
 0x147   : > { %v923_v52 = vsel %vm914_vm10, %v906_v59, %v764_v60 }
 0x148   : > { %1374 = vmatmul.msk.f32.vlgmr.msra.gmra.mxu2 %vm936_vm11, %v923_v52 }
 0x14a   : > { %625 = vrot.lane.b32.xlu2 %v1970_v3, %s1617_s30 }
 0x14b   : > { %665 = vrot.lane.b32.xlu1 %v1819_v37, %s1621_s10  ;;  %583 = vrot.lane.b32.xlu0 %v2225_v22, %s1618_s5  ;;  %v277_v37 = vld [vmem:[%s1727_s14 + $0xe0] sm:$0xff]  ;;  %v406_v22 = vrot.slane %v276_v39, 2  ;;  %s1359_s14 = sshll.u32 %s1596_s18, 3 }
 0x14c   : > { %v670_v47 = vpop.permute.xlu2 %669  ;;  %v402_v36 = vrot.slane %v277_v37, 1  ;;  %v407_v30 = vrot.slane %v277_v37, 2  ;;  %p238_p13 = scmp.lt.s32.totalorder %s1359_s14, 15 }
 0x14d   : > { %v608_v55 = vpop.permute.xlu1 %607  ;;  %v566_v56 = vpop.permute.xlu0 %565 }
 0x14e   : > { %v408_v63 = vsel %vm344_vm1, %v406_v22, %v407_v30  ;;  %v405_v32 = vsel %vm303_vm0, %v402_v36, %v404_v48  ;;  %s2660_s14 = smov (!%p238_p13, %s1359_s14), 15 }
 0x152   : > { %673 = vrot.lane.b32.xlu2 %v1853_v49, %s1621_s10  ;;  %v401_v49 = vrot.slane %v276_v39, 1 }
 0x153   : > { %713 = vrot.lane.b32.xlu1 %v1841_v45, %s1620_s9  ;;  %631 = vrot.lane.b32.xlu0 %v2246_v25, %s1617_s30 }
 0x154   : > { %v758_v51 = vpop.permute.xlu2 %757  ;;  %v403_v5 = vsel %vm303_vm0, %v401_v49, %v402_v36 }
 0x155   : > { %v580_v3 = vpop.permute.xlu1 %579  ;;  %v574_v27 = vpop.permute.xlu0 %573 }
 0x156   : > { %v859_v23 = vsel %vm846_vm6, %v2168_v8, %v580_v3 }
 0x15a   : > { %721 = vrot.lane.b32.xlu2 %v1900_v10, %s1620_s9  ;;  %v852_v10 = vsel %vm846_vm6, %v2189_v18, %v566_v56  ;;  %v849_v18 = vsel %vm846_vm6, %v2171_v38, %v2302_v29 }
 0x15b   : > { %761 = vrot.lane.b32.xlu1 %v1976_v6, %s1619_s6  ;;  %679 = vrot.lane.b32.xlu0 %v276_v39, %s1621_s10  ;;  %v869_v6 = vsel %vm863_vm7, %v852_v10, %v614_v28  ;;  %v409_v28 = vrot.slane %v278_v9, 2 }
 0x15c   : > { %v766_v25 = vpop.permute.xlu2 %765 }
 0x15d   : > { %v622_v45 = vpop.permute.xlu1 %621  ;;  %v662_v26 = vpop.permute.xlu0 %661 }
 0x15e   : > { %v886_v14 = vsel %vm880_vm8, %v869_v6, %v662_v26 }
 0x162   : > { %775 = vrot.lane.b32.xlu2 %v408_v63, %s1619_s6 }
 0x163   : > { %769 = vrot.lane.b32.xlu1 %v1988_v11, %s1619_s6  ;;  %727 = vrot.lane.b32.xlu0 %v403_v5, %s1620_s9  ;;  %v866_v11 = vsel %vm863_vm7, %v849_v18, %v608_v55 }
 0x164   : > { %v568_v40 = vpop.permute.xlu2 %567  ;;  %v883_v43 = vsel %vm880_vm8, %v866_v11, %v2331_v31 }
 0x165   : > { %v710_v41 = vpop.permute.xlu1 %709  ;;  %v704_v35 = vpop.permute.xlu0 %703  ;;  %v853_v49 = vsel %vm846_vm6, %v2137_v44, %v568_v40 }
 0x166   : > { %v903_v61 = vsel %vm897_vm9, %v886_v14, %v710_v41  ;;  %v900_v38 = vsel %vm897_vm9, %v883_v43, %v704_v35 }
 0x167   : > { %v920_v4 = vsel %vm914_vm10, %v903_v61, %v758_v51 }
 0x168   : > { %1371 = vmatmul.msk.f32.gmra.mxu1 %vm936_vm11, %v920_v4 }
 0x16a   : > { %681 = vrot.lane.b32.xlu2 %v277_v37, %s1621_s10  ;;  %s229_s10 = scalar_lea.vmem [#allocation4], %s2558_s11 }
 0x16b   : > { %585 = vrot.lane.b32.xlu0 %v2319_v58, %s1618_s5  ;;  %633 = vrot.lane.b32.xlu1 %v2314_v20, %s1617_s30  ;;  %v410_v58 = vsel %vm344_vm1, %v407_v30, %v409_v28  ;;  %v856_v20 = vsel %vm846_vm6, %v2155_v0, %v574_v27  ;;  %v876_v0 = vsel %vm863_vm7, %v859_v23, %v2345_v57  ;;  %s1360_s30 = sshll.u32 %s2660_s14, 1  ;;  %s1361_s5 = sshll.u32 %s1720_s8, 5 }
 0x16c   : > { %v873_v54 = vsel %vm863_vm7, %v856_v20, %v622_v45  ;;  %v576_v33 = vpop.permute.xlu2 %575  ;;  %s1382_s8 = sshll.u32 %s1600_s19, 1  ;;  %s2573_s24 = sshll.u32 %s229_s10, 4  ;;  %s1210_s24 = int_to_ptr.vmem [resolvable:$true] %s2573_s24 }
 0x16d   : > { %v752_v29 = vpop.permute.xlu1 %751  ;;  %v676_v12 = vpop.permute.xlu0 %675  ;;  %v890_v31 = vsel %vm880_vm8, %v873_v54, %v670_v47  ;;  %v857_v41 = vsel %vm846_vm6, %v2241_v62, %v576_v33  ;;  %s1191_s12 = sadd.s32 %s1596_s18, %s1382_s8  ;;  %s1174_s8 = scalar_lea.sflag [#allocation3], %s2558_s11 }
 0x16e   : > { %v917_v46 = vsel %vm914_vm10, %v900_v38, %v752_v29  ;;  %v893_v15 = vsel %vm880_vm8, %v876_v0, %v676_v12  ;;  %s1192_s14 = scalar_lea.hbm %s2642_s3, %s1191_s12  ;;  %s1506_s19 = scalar_lea.hbm %s2642_s3, 4 }
 0x16f   : > { %1368 = vmatmul.msk.f32.gmra.mxu0 %vm936_vm11, %v917_v46  ;;  %s2570_s18 = sshll.u32 %s1192_s14, 4  ;;  %s1197_s18 = int_to_ptr.hbm [resolvable:$true] %s2570_s18 }
 0x173   : > { %729 = vrot.lane.b32.xlu0 %v405_v32, %s1620_s9  ;;  %777 = vrot.lane.b32.xlu1 %v410_v58, %s1619_s6  ;;  %s242_s6 = sadd.s32 %s1361_s5, %s1360_s30  ;;  %s1207_s5 = scalar_lea.hbm %s2643_s4, %s1191_s12 }
 0x174   : > { %v664_v34 = vpop.permute.xlu2 %663  ;;  %s1362_s9 = sshll.u32 %s242_s6, 3  ;;  %s223_s6 = scalar_lea.vmem [#allocation2], %s2558_s11 }
 0x175   : > { %v724_v7 = vpop.permute.xlu1 %723  ;;  %v718_v2 = vpop.permute.xlu0 %717  ;;  %s2422_s27 = scalar_lea.vmem %s2641_s2, %s1362_s9  ;;  %s2568_s9 = sshll.u32 %s223_s6, 4  ;;  %s1195_s9 = int_to_ptr.vmem [resolvable:$true] %s2568_s9 }
 0x176   : > { %v907_v24 = vsel %vm897_vm9, %v890_v31, %v718_v2  ;;  %v910_v1 = vsel %vm897_vm9, %v893_v15, %v724_v7  ;;  %s1500_s12 = sshra.s32 %s1197_s18, 4  ;;  %s1501_s12 = int_to_ptr.hbm [resolvable:$true] %s1500_s12 }
 0x177   : > { %v924_v21 = vsel %vm914_vm10, %v907_v24, %v766_v25  ;;  %s1502_s13 = scalar_lea.hbm %s1501_s12, 1  ;;  %p1507_p4 = scmp.lt.s32.totalorder %s1501_s12, %s2642_s3 }
 0x178   : > { %1375 = vmatmul.msk.f32.gmra.mxu2 %vm936_vm11, %v924_v21  ;;  %p1503_p0 = scmp.ne.s32.totalorder %s1501_s12, %s1502_s13  ;;  %p1508_p5 = scmp.lt.s32.totalorder %s1506_s19, %s1502_s13 }
 0x17a   : > { %p1504_p1 = pnand %p1503_p0, %p1698_p3  ;;  %p1509_p6 = por %p1508_p5, %p1507_p4 }
 0x17c   : > { %v706_v8 = vpop.permute.xlu2 %705  ;;  %p1505_p2 = pneg %p1504_p1 }
 0x17d   : > { %v562_v60 = vpop.permute.xlu1 %561  ;;  %v772_v42 = vpop.permute.xlu0 %771 }
 0x17e   : > { %v927_v59 = vsel %vm914_vm10, %v910_v1, %v772_v42  ;;  %v850_v36 = vsel %vm846_vm6, %v2119_v16, %v562_v60  ;;  %p1510_p7 = pnand %p1509_p6, %p1505_p2 }
 0x17f   : > { %1378 = vmatmul.msk.f32.vlgmr.msra.gmra.mxu3 %vm936_vm11, %v927_v59 }
 0x184   : > { %v678_v57 = vpop.permute.xlu2 %677 }
 0x185   : > { %v616_v52 = vpop.permute.xlu1 %615  ;;  %v610_v47 = vpop.permute.xlu0 %609 }
 0x186   : > { %v870_v45 = vsel %vm863_vm7, %v853_v49, %v616_v52  ;;  %v867_v26 = vsel %vm863_vm7, %v850_v36, %v610_v47 }
 0x187   : > { %v887_v63 = vsel %vm880_vm8, %v870_v45, %v664_v34 }
 0x18c   : > { %v720_v27 = vpop.permute.xlu2 %719 }
 0x18d   : > { %v658_v55 = vpop.permute.xlu1 %657  ;;  %v582_v56 = vpop.permute.xlu0 %581 }
 0x18e   : > { %v884_v30 = vsel %vm880_vm8, %v867_v26, %v658_v55  ;;  %v860_v35 = vsel %vm846_vm6, %v2260_v50, %v582_v56 }
 0x18f   : > { %v901_v14 = vsel %vm897_vm9, %v884_v30, %v706_v8 }
 0x194   : > { %v774_v25 = vpop.permute.xlu2 %773 }
 0x195   : > { %v630_v51 = vpop.permute.xlu1 %629  ;;  %v624_v3 = vpop.permute.xlu0 %623 }
 0x196   : > { %v874_v61 = vsel %vm863_vm7, %v857_v41, %v624_v3  ;;  %v877_v18 = vsel %vm863_vm7, %v860_v35, %v630_v51 }
 0x197   : > { %v894_v9 = vsel %vm880_vm8, %v877_v18, %v678_v57 }
 0x19c   : > { %v578_v48 = vpop.permute.xlu2 %577 }
 0x19d   : > { %v672_v39 = vpop.permute.xlu1 %671  ;;  %v712_v37 = vpop.permute.xlu0 %711 }
 0x19e   : > { %v1006_v22 = vpop.f32.mrf.mxu0  ;;  %v904_v5 = vsel %vm897_vm9, %v887_v63, %v712_v37  ;;  %v891_v40 = vsel %vm880_vm8, %v874_v61, %v672_v39 }
 0x19f   : > { %1054 = vst.msk [vmem:[%s2422_s27] sm:$0xff] %vm812_vm2, %v1006_v22  ;;  %v908_v62 = vsel %vm897_vm9, %v891_v40, %v720_v27  ;;  %v1109_v32 = vmul.f32 %v1006_v22, %v1006_v22  ;;  %v1070_v20 = vsel %vm812_vm2, %v1006_v22, 0.0 }
 0x1a1   : > { %v1125_v24 = vsel %vm812_vm2, %v1109_v32, 0.0 }
 0x1a4   : > { %v626_v46 = vpop.permute.xlu2 %625 }
 0x1a5   : > { %v760_v10 = vpop.permute.xlu1 %759  ;;  %v754_v6 = vpop.permute.xlu0 %753 }
 0x1a6   : > { %v918_v44 = vsel %vm914_vm10, %v901_v14, %v754_v6  ;;  %v921_v16 = vsel %vm914_vm10, %v904_v5, %v760_v10 }
 0x1a7   : > { %1369 = vmatmul.msk.f32.gmra.mxu0 %vm936_vm11, %v918_v44  ;;  %1372 = vmatmul.msk.f32.gmra.mxu1 %vm936_vm11, %v921_v16 }
 0x1a9   : > { %v2445_v4 = vpop.f32.mrf.mxu1 }
 0x1aa   : > { %1058 = vst.msk [vmem:[%s2422_s27 + $0x20] sm:$0xff] %vm812_vm2, %v2445_v4 }
 0x1ac   : > { %v674_v0 = vpop.permute.xlu2 %673 }
 0x1ad   : > { %v768_v11 = vpop.permute.xlu1 %767  ;;  %v726_v43 = vpop.permute.xlu0 %725 }
 0x1ae   : > { %v911_v50 = vsel %vm897_vm9, %v894_v9, %v726_v43  ;;  %v925_v28 = vsel %vm914_vm10, %v908_v62, %v768_v11 }
 0x1af   : > { %1376 = vmatmul.msk.f32.gmra.mxu2 %vm936_vm11, %v925_v28  ;;  %v928_v38 = vsel %vm914_vm10, %v911_v50, %v774_v25  ;;  %v1113_v50 = vmul.f32 %v2445_v4, %v2445_v4 }
 0x1b0   : > { %1379 = vmatmul.msk.f32.gmra.mxu3 %vm936_vm11, %v928_v38 }
 0x1b4   : > { %v722_v59 = vpop.permute.xlu2 %721 }
 0x1b5   : > { %v618_v29 = vpop.permute.xlu1 %617  ;;  %v570_v12 = vpop.permute.xlu0 %569 }
 0x1b6   : > { %v854_v1 = vsel %vm846_vm6, %v2217_v19, %v570_v12  ;;  %v858_v19 = vsel %vm846_vm6, %v2237_v17, %v578_v48  ;;  %v1077_v12 = vsel %vm812_vm2, %v2445_v4, 0.0 }
 0x1b7   : > { %v871_v60 = vsel %vm863_vm7, %v854_v1, %v618_v29  ;;  %v875_v57 = vsel %vm863_vm7, %v858_v19, %v626_v46 }
 0x1b8   : > { %v892_v3 = vsel %vm880_vm8, %v875_v57, %v674_v0 }
 0x1b9   : > { %v909_v37 = vsel %vm897_vm9, %v892_v3, %v722_v59 }
 0x1bc   : > { %v1009_v58 = vpop.f32.mrf.mxu0  ;;  %v776_v39 = vpop.permute.xlu2 %775 }
 0x1bd   : > { %1055 = vst.msk [vmem:[%s2422_s27 + $0x8] sm:$0xff] %vm812_vm2, %v1009_v58  ;;  %v1071_v54 = vsel %vm812_vm2, %v1009_v58, 0.0  ;;  %v1110_v33 = vmul.f32 %v1009_v58, %v1009_v58  ;;  %v666_v7 = vpop.permute.xlu1 %665  ;;  %v584_v31 = vpop.permute.xlu0 %583 }
 0x1be   : > { %v1072_v2 = vadd.f32 %v1071_v54, %v1070_v20  ;;  %v888_v52 = vsel %vm880_vm8, %v871_v60, %v666_v7  ;;  %v861_v51 = vsel %vm846_vm6, %v2256_v53, %v584_v31  ;;  %v1132_v54 = vsel %vm812_vm2, %v1113_v50, 0.0 }
 0x1bf   : > { %v1126_v21 = vsel %vm812_vm2, %v1110_v33, 0.0 }
 0x1c0   : > { %v1127_v23 = vadd.f32 %v1126_v21, %v1125_v24 }
 0x1c4   : > { %v682_v5 = vpop.permute.xlu2 %681 }
 0x1c5   : > { %v714_v15 = vpop.permute.xlu1 %713  ;;  %v632_v34 = vpop.permute.xlu0 %631 }
 0x1c6   : > { %v905_v47 = vsel %vm897_vm9, %v888_v52, %v714_v15  ;;  %v878_v27 = vsel %vm863_vm7, %v861_v51, %v632_v34 }
 0x1cb   : > { %v2468_v42 = vpop.f32.mrf.mxu2 }
 0x1cc   : > { %1062 = vst.msk [vmem:[%s2422_s27 + $0x40] sm:$0xff] %vm812_vm2, %v2468_v42  ;;  %v1117_v1 = vmul.f32 %v2468_v42, %v2468_v42 }
 0x1cd   : > { %v762_v8 = vpop.permute.xlu1 %761  ;;  %v680_v55 = vpop.permute.xlu0 %679 }
 0x1ce   : > { %v922_v56 = vsel %vm914_vm10, %v905_v47, %v762_v8  ;;  %v895_v22 = vsel %vm880_vm8, %v878_v27, %v680_v55  ;;  %v1085_v55 = vsel %vm812_vm2, %v2468_v42, 0.0  ;;  %v1140_v3 = vsel %vm812_vm2, %v1117_v1, 0.0 }
 0x1cf   : > { %1373 = vmatmul.msk.f32.gmra.mxu1 %vm936_vm11, %v922_v56 }
 0x1d5   : > { %v770_v49 = vpop.permute.xlu1 %769  ;;  %v728_v36 = vpop.permute.xlu0 %727 }
 0x1d6   : > { %v912_v45 = vsel %vm897_vm9, %v895_v22, %v728_v36  ;;  %v926_v17 = vsel %vm914_vm10, %v909_v37, %v770_v49 }
 0x1d7   : > { %1377 = vmatmul.msk.f32.gmra.mxu2 %vm936_vm11, %v926_v17  ;;  %v929_v53 = vsel %vm914_vm10, %v912_v45, %v776_v39 }
 0x1d8   : > { %1380 = vmatmul.msk.f32.gmra.mxu3 %vm936_vm11, %v929_v53 }
 0x1dd   : > { %v586_v26 = vpop.permute.xlu0 %585  ;;  %v634_v30 = vpop.permute.xlu1 %633 }
 0x1de   : > { %v862_v25 = vsel %vm846_vm6, %v2184_v13, %v586_v26 }
 0x1df   : > { %v879_v63 = vsel %vm863_vm7, %v862_v25, %v634_v30 }
 0x1e0   : > { %v896_v10 = vsel %vm880_vm8, %v879_v63, %v682_v5 }
 0x1e5   : > { %v1021_v6 = vpop.f32.mrf.mxu1  ;;  %v730_v14 = vpop.permute.xlu0 %729 }
 0x1e6   : > { %1059 = vst.msk [vmem:[%s2422_s27 + $0x28] sm:$0xff] %vm812_vm2, %v1021_v6  ;;  %v913_v44 = vsel %vm897_vm9, %v896_v10, %v730_v14  ;;  %v778_v16 = vpop.permute.xlu1 %777  ;;  %v1114_v46 = vmul.f32 %v1021_v6, %v1021_v6  ;;  %v1079_v33 = vsel %vm812_vm2, %v1021_v6, 0.0 }
 0x1e7   : > { %v930_v41 = vsel %vm914_vm10, %v913_v44, %v778_v16 }
 0x1e8   : > { %1381 = vmatmul.msk.f32.gmra.mxu3 %vm936_vm11, %v930_v41 }
 0x1ec   : > { %v1012_v13 = vpop.f32.mrf.mxu0 }
 0x1ed   : > { %1056 = vst.msk [vmem:[%s2422_s27 + $0x10] sm:$0xff] %vm812_vm2, %v1012_v13  ;;  %v1073_v35 = vsel %vm812_vm2, %v1012_v13, 0.0  ;;  %v1111_v61 = vmul.f32 %v1012_v13, %v1012_v13 }
 0x1ee   : > { %v1074_v18 = vadd.f32 %v1073_v35, %v1072_v2  ;;  %v1134_v2 = vsel %vm812_vm2, %v1114_v46, 0.0 }
 0x1ef   : > { %v1128_v40 = vsel %vm812_vm2, %v1111_v61, 0.0 }
 0x1f0   : > { %v1129_v11 = vadd.f32 %v1128_v40, %v1127_v23 }
 0x1fb   : > { %v1033_v9 = vpop.f32.mrf.mxu2 }
 0x1fc   : > { %1063 = vst.msk [vmem:[%s2422_s27 + $0x48] sm:$0xff] %vm812_vm2, %v1033_v9  ;;  %v1118_v56 = vmul.f32 %v1033_v9, %v1033_v9  ;;  %v1087_v27 = vsel %vm812_vm2, %v1033_v9, 0.0 }
 0x1fe   : > { %v1142_v22 = vsel %vm812_vm2, %v1118_v56, 0.0 }
 0x202   : > { %v1042_v43 = vpop.f32.mrf.mxu3 }
 0x203   : > { %1066 = vst.msk [vmem:[%s2422_s27 + $0x60] sm:$0xff] %vm812_vm2, %v1042_v43  ;;  %v1121_v53 = vmul.f32 %v1042_v43, %v1042_v43  ;;  %v1093_v6 = vsel %vm812_vm2, %v1042_v43, 0.0 }
 0x205   : > { %v1148_v41 = vsel %vm812_vm2, %v1121_v53, 0.0 }
 0x224   : > { %v1015_v62 = vpop.f32.mrf.mxu0  ;;  %v1024_v48 = vpop.f32.mrf.mxu1 }
 0x225   : > { %1057 = vst.msk [vmem:[%s2422_s27 + $0x18] sm:$0xff] %vm812_vm2, %v1015_v62  ;;  %v1075_v28 = vsel %vm812_vm2, %v1015_v62, 0.0  ;;  %v1112_v38 = vmul.f32 %v1015_v62, %v1015_v62  ;;  %v1115_v4 = vmul.f32 %v1024_v48, %v1024_v48  ;;  %v1081_v0 = vsel %vm812_vm2, %v1024_v48, 0.0 }
 0x226   : > { %v1076_v29 = vadd.f32 %v1075_v28, %v1074_v18  ;;  %1060 = vst.msk [vmem:[%s2422_s27 + $0x30] sm:$0xff] %vm812_vm2, %v1024_v48 }
 0x227   : > { %v1130_v32 = vsel %vm812_vm2, %v1112_v38, 0.0  ;;  %v1136_v60 = vsel %vm812_vm2, %v1115_v4, 0.0 }
 0x228   : > { %v1078_v58 = vadd.f32 %v1077_v12, %v1076_v29  ;;  %v1131_v20 = vadd.f32 %v1130_v32, %v1129_v11 }
 0x22a   : > { %v1133_v7 = vadd.f32 %v1132_v54, %v1131_v20  ;;  %v1080_v31 = vadd.f32 %v1079_v33, %v1078_v58 }
 0x22c   : > { %v1135_v24 = vadd.f32 %v1134_v2, %v1133_v7  ;;  %v1082_v15 = vadd.f32 %v1081_v0, %v1080_v31 }
 0x22e   : > { %v1137_v47 = vadd.f32 %v1136_v60, %v1135_v24 }
 0x232   : > { %v1036_v21 = vpop.f32.mrf.mxu2 }
 0x233   : > { %1064 = vst.msk [vmem:[%s2422_s27 + $0x50] sm:$0xff] %vm812_vm2, %v1036_v21  ;;  %v1045_v23 = vpop.f32.mrf.mxu3  ;;  %v1119_v36 = vmul.f32 %v1036_v21, %v1036_v21  ;;  %v1089_v45 = vsel %vm812_vm2, %v1036_v21, 0.0 }
 0x234   : > { %1067 = vst.msk [vmem:[%s2422_s27 + $0x68] sm:$0xff] %vm812_vm2, %v1045_v23  ;;  %v1122_v35 = vmul.f32 %v1045_v23, %v1045_v23  ;;  %v1095_v61 = vsel %vm812_vm2, %v1045_v23, 0.0 }
 0x235   : > { %v1144_v26 = vsel %vm812_vm2, %v1119_v36, 0.0 }
 0x236   : > { %v1150_v40 = vsel %vm812_vm2, %v1122_v35, 0.0 }
 0x24c   : > { %v1027_v34 = vpop.f32.mrf.mxu1 }
 0x24d   : > { %1061 = vst.msk [vmem:[%s2422_s27 + $0x38] sm:$0xff] %vm812_vm2, %v1027_v34  ;;  %v1083_v59 = vsel %vm812_vm2, %v1027_v34, 0.0  ;;  %v1116_v52 = vmul.f32 %v1027_v34, %v1027_v34 }
 0x24e   : > { %v1084_v8 = vadd.f32 %v1083_v59, %v1082_v15 }
 0x24f   : > { %v1138_v19 = vsel %vm812_vm2, %v1116_v52, 0.0 }
 0x250   : > { %v1086_v57 = vadd.f32 %v1085_v55, %v1084_v8  ;;  %v1139_v51 = vadd.f32 %v1138_v19, %v1137_v47 }
 0x252   : > { %v1141_v39 = vadd.f32 %v1140_v3, %v1139_v51  ;;  %v1088_v37 = vadd.f32 %v1087_v27, %v1086_v57 }
 0x254   : > { %v1143_v49 = vadd.f32 %v1142_v22, %v1141_v39  ;;  %v1090_v17 = vadd.f32 %v1089_v45, %v1088_v37 }
 0x256   : > { %v1145_v10 = vadd.f32 %v1144_v26, %v1143_v49 }
 0x25a   : > { %v1039_v42 = vpop.f32.mrf.mxu2 }
 0x25b   : > { %1065 = vst.msk [vmem:[%s2422_s27 + $0x58] sm:$0xff] %vm812_vm2, %v1039_v42  ;;  %v1091_v30 = vsel %vm812_vm2, %v1039_v42, 0.0  ;;  %v1120_v25 = vmul.f32 %v1039_v42, %v1039_v42  ;;  %v1048_v63 = vpop.f32.mrf.mxu3 }
 0x25c   : > { %v1092_v5 = vadd.f32 %v1091_v30, %v1090_v17  ;;  %1068 = vst.msk [vmem:[%s2422_s27 + $0x70] sm:$0xff] %vm812_vm2, %v1048_v63  ;;  %v1123_v11 = vmul.f32 %v1048_v63, %v1048_v63  ;;  %v1097_v43 = vsel %vm812_vm2, %v1048_v63, 0.0 }
 0x25d   : > { %v1146_v14 = vsel %vm812_vm2, %v1120_v25, 0.0 }
 0x25e   : > { %v1094_v44 = vadd.f32 %v1093_v6, %v1092_v5  ;;  %v1147_v16 = vadd.f32 %v1146_v14, %v1145_v10  ;;  %v1152_v50 = vsel %vm812_vm2, %v1123_v11, 0.0 }
 0x260   : > { %v1149_v13 = vadd.f32 %v1148_v41, %v1147_v16  ;;  %v1096_v18 = vadd.f32 %v1095_v61, %v1094_v44 }
 0x262   : > { %v1151_v9 = vadd.f32 %v1150_v40, %v1149_v13  ;;  %v1098_v62 = vadd.f32 %v1097_v43, %v1096_v18 }
 0x264   : > { %v1153_v29 = vadd.f32 %v1152_v50, %v1151_v9 }
 0x26b   : > { %v1051_v48 = vpop.f32.mrf.mxu3 }
 0x26c   : > { %1069 = vst.msk [vmem:[%s2422_s27 + $0x78] sm:$0xff] %vm812_vm2, %v1051_v48  ;;  %v1099_v28 = vsel %vm812_vm2, %v1051_v48, 0.0  ;;  %v1124_v38 = vmul.f32 %v1051_v48, %v1051_v48  ;;  %s2575_s27 = sshll.u32 %s1207_s5, 4  ;;  %s1212_s27 = int_to_ptr.hbm [resolvable:$true] %s2575_s27 }
 0x26d   : > { %v1100_v12 = vadd.f32 %v1099_v28, %v1098_v62 }
 0x26e   : > { %v1154_v46 = vsel %vm812_vm2, %v1124_v38, 0.0 }
 0x26f   : > { %v1101_v32 = vrot.slane %v1100_v12, 4  ;;  %v1155_v58 = vadd.f32 %v1154_v46, %v1153_v29 }
 0x271   : > { %v1102_v20 = vadd.f32 %v1101_v32, %v1100_v12  ;;  %v1156_v54 = vrot.slane %v1155_v58, 4 }
 0x273   : > { %v1103_v33 = vrot.slane %v1102_v20, 2  ;;  %v1157_v7 = vadd.f32 %v1156_v54, %v1155_v58 }
 0x275   : > { %v1104_v31 = vadd.f32 %v1103_v33, %v1102_v20  ;;  %v1158_v2 = vrot.slane %v1157_v7, 2 }
 0x277   : > { %v1105_v24 = vrot.slane %v1104_v31, 1  ;;  %v1159_v21 = vadd.f32 %v1158_v2, %v1157_v7 }
 0x279   : > { %v1106_v23 = vadd.f32 %v1105_v24, %v1104_v31  ;;  %v1160_v4 = vrot.slane %v1159_v21, 1 }
 0x27b   : > { %1108 = vst.msk [vmem:[%s223_s6] sm:$0x1] %vm1107_vm12, %v1106_v23  ;;  %v1161_v0 = vadd.f32 %v1160_v4, %v1159_v21 }
 0x27c   : > { %1513 = shalt.err (!%p1510_p7)
}
 0x27d   : > { %1402 = dma.vmem_to_hbm [thread:$0]  (%p1698_p3), %s1195_s9, 16, %s1197_s18, %s1174_s8   ;;  %1162 = vst.msk [vmem:[%s229_s10] sm:$0x1] %vm1107_vm12, %v1161_v0 }
 0x27e   : > { %s1178_s6 = scalar_lea.sflag [#allocation5], %s2558_s11  ;;  %s1528_s23 = sshra.s32 %s1212_s27, 4  ;;  %s1529_s23 = int_to_ptr.hbm [resolvable:$true] %s1528_s23 }
 0x27f   : > { %s1530_s14 = scalar_lea.hbm %s1529_s23, 1  ;;  %s1534_s19 = scalar_lea.hbm %s2643_s4, 4 }
 0x280   : > { %p1531_p9 = scmp.ne.s32.totalorder %s1529_s23, %s1530_s14  ;;  %p1535_p12 = scmp.lt.s32.totalorder %s1529_s23, %s2643_s4 }
 0x281   : > { %p1536_p13 = scmp.lt.s32.totalorder %s1534_s19, %s1530_s14 }
 0x282   : > { %p1532_p10 = pnand %p1531_p9, %p1698_p3 }
 0x283   : > { %p1537_p0 = por %p1536_p13, %p1535_p12 }
 0x284   : > { %p1533_p11 = pneg %p1532_p10 }
 0x286   : > { %p1538_p1 = pnand %p1537_p0, %p1533_p11 }
 0x288   : > { %1541 = shalt.err (!%p1538_p1)
}
 0x289   : > { %1403 = dma.vmem_to_hbm [thread:$0]  (%p1698_p3), %s1210_s24, 16, %s1212_s27, %s1178_s6  }
 0x28a PF: > { %p1413_p2 = scmp.ge.s32.totalorder %s1612_s22, 2  ;;  %s1236_s11 = sand.u32 1, %s1584_s15  }
 0x28b   : > { %s1237_s9 = scalar_lea.sflag [#allocation3], %s1236_s11 }
 0x28c   : > { %p1407_p4 = pnand %p1413_p2, %p1707_p8 }
 0x28e   : > { %p1408_p5 = pneg %p1407_p4 }
 0x290   : > { %1575 = dma.done.wait (%p1408_p5), %s1237_s9, 16  }
 0x291   : > { %1577 = vsyncadd (%p1408_p5), %s1237_s9, 4294967280  ;;  %s1246_s18 = scalar_lea.sflag [#allocation5], %s1236_s11 }
 0x292   : > { %1579 = dma.done.wait (%p1408_p5), %s1246_s18, 16  }
 0x293   : > { %1581 = vsyncadd (%p1408_p5), %s1246_s18, 4294967280  ;;  %s21_s22 = sadd.s32 1, %s1612_s22   ;;  %s2646_s15 = smov %s1588_s16 }
 0x294   : > { %p18_p6 = scmp.ge.s32.totalorder %s21_s22, 6   ;;  %s2647_s16 = smov %s1592_s17 }
 0x295   : > { %s2648_s17 = smov %s1716_s7  ;;  %s2649_s18 = smov %s1604_s20 }
 0x296   : > { %s2650_s19 = smov %s1608_s21  ;;  %s2651_s20 = smov %s2654_s25 }
 0x297   : > { %s2652_s21 = smov %s2658_s26  ;;  %20 = sbr.rel (!%p18_p6) target bundleno = 7 (0x7), region = 93 }
 0x29c   :  { %1251 = vsyncpa [#allocation3], 1 }
 0x29d   :  { %1253 = vsyncpa [#allocation3 + $0x1], 1 }
 0x29e   :  { %1254 = vsyncpa [#allocation5], 1 }
 0x29f   :  { %1256 = vsyncpa [#allocation5 + $0x1], 1 }

</bundles_post_ra>
